<compile_context>
chip_gen: v5e
topology: v5e:2x2
jax: 0.10.0
libtpu: 0.0.40
codegen_flags: <defaults>
</compile_context>

<pallas_src>
import jax
import jax.numpy as jnp
from jax.experimental import pallas as pl
from jax.experimental.pallas import tpu as pltpu

SIZE = 7
WALLS_SIZE = (SIZE - 1) * (SIZE - 1)                          # 36
ACTION_SIZE = 16 + 2 * WALLS_SIZE                             # 88
STATE_SIZE = 2 * SIZE * SIZE + 2 * (SIZE - 1) * (SIZE - 1)    # 170
HIDDEN_SIZE = 128

K_PAD = 256      # STATE_SIZE padded to a clean MXU K (2x128 / 1x256)
N_PAD = 128      # ACTION_SIZE padded to a lane-dense output width
MAX_TB = 256     # batch tile (>=256 amortizes ~0.35us/step grid overhead)


def _round_up(n, m):
    return ((n + m - 1) // m) * m


def _mlp_kernel(x_ref, w1_ref, b1_ref, w2_ref, b2_ref, o_ref):
    """Fused linear1 -> linear2 forward pass on one batch tile.

    x_ref : [TB, K_PAD]        bf16 (VMEM)   zero-padded state features
    w1_ref: [K_PAD, HIDDEN]    bf16 (VMEM)   linear1.weight.T, zero-padded K
    b1_ref: [1, HIDDEN]        f32  (VMEM)
    w2_ref: [HIDDEN, N_PAD]    bf16 (VMEM)   linear2.weight.T, zero-padded N
    b2_ref: [1, N_PAD]         f32  (VMEM)   zero-padded
    o_ref : [TB, N_PAD]        f32  (VMEM)   lane-dense output
    """
    x = x_ref[...]
    # linear1: bf16 x bf16 -> f32 accumulate on the MXU, bias add in f32.
    h = jnp.dot(x, w1_ref[...], preferred_element_type=jnp.float32) + b1_ref[...]
    # linear2: feed the MXU bf16 again (native rate); accumulate in f32.
    h = h.astype(jnp.bfloat16)
    o = jnp.dot(h, w2_ref[...], preferred_element_type=jnp.float32) + b2_ref[...]
    o_ref[...] = o


def prepare_params(w1_t, b1, w2_t, b2):
    """One-time pad/cast of params into the kernel layout.

    w1_t: [STATE_SIZE, HIDDEN] f32 -> [K_PAD, HIDDEN] bf16 (zero rows added)
    b1  : [1, HIDDEN]          f32 (unchanged)
    w2_t: [HIDDEN, ACTION_SIZE] f32 -> [HIDDEN, N_PAD] bf16 (zero cols added)
    b2  : [1, ACTION_SIZE]     f32 -> [1, N_PAD] f32 (zero cols added)
    """
    w1_p = jnp.zeros((K_PAD, HIDDEN_SIZE), jnp.bfloat16)
    w1_p = w1_p.at[:STATE_SIZE, :].set(w1_t.astype(jnp.bfloat16))
    w2_p = jnp.zeros((HIDDEN_SIZE, N_PAD), jnp.bfloat16)
    w2_p = w2_p.at[:, :ACTION_SIZE].set(w2_t.astype(jnp.bfloat16))
    b2_p = jnp.zeros((1, N_PAD), jnp.float32)
    b2_p = b2_p.at[:, :ACTION_SIZE].set(b2)
    return w1_p, b1.astype(jnp.float32), w2_p, b2_p


def simple_policy_net_forward(x, w1_p, b1, w2_p, b2_p):
    """x: [B, STATE_SIZE] f32 -> [B, ACTION_SIZE] f32 (params pre-prepared)."""
    B = x.shape[0]
    # Batch tile: big enough to amortize per-step overhead, multiple of 8
    # sublanes; tiny batches collapse to a single grid step.
    tb = MAX_TB if B >= MAX_TB else _round_up(B, 8)
    b_pad = _round_up(B, tb)
    grid = (b_pad // tb,)

    # Zero-pad x to [b_pad, K_PAD] in bf16 (zero K-cols multiply zero w1 rows).
    x_p = jnp.zeros((b_pad, K_PAD), jnp.bfloat16)
    x_p = x_p.at[:B, :STATE_SIZE].set(x.astype(jnp.bfloat16))

    flops = 2 * b_pad * (K_PAD * HIDDEN_SIZE + HIDDEN_SIZE * N_PAD)
    bytes_accessed = (
        x_p.size * 2                      # bf16 input
        + w1_p.size * 2 + w2_p.size * 2   # bf16 weights
        + b1.size * 4 + b2_p.size * 4     # f32 biases
        + b_pad * N_PAD * 4               # f32 output
    )

    out = pl.pallas_call(
        _mlp_kernel,
        out_shape=jax.ShapeDtypeStruct((b_pad, N_PAD), jnp.float32),
        grid_spec=pltpu.PrefetchScalarGridSpec(
            num_scalar_prefetch=0,
            grid=grid,
            in_specs=[
                pl.BlockSpec((tb, K_PAD), lambda i: (i, 0)),          # x tile
                pl.BlockSpec((K_PAD, HIDDEN_SIZE), lambda i: (0, 0)),  # w1 resident
                pl.BlockSpec((1, HIDDEN_SIZE), lambda i: (0, 0)),      # b1 resident
                pl.BlockSpec((HIDDEN_SIZE, N_PAD), lambda i: (0, 0)),  # w2 resident
                pl.BlockSpec((1, N_PAD), lambda i: (0, 0)),            # b2 resident
            ],
            out_specs=pl.BlockSpec((tb, N_PAD), lambda i: (i, 0)),
        ),
        compiler_params=pltpu.CompilerParams(
            dimension_semantics=("parallel",)),
        cost_estimate=pl.CostEstimate(
            flops=flops, transcendentals=0, bytes_accessed=bytes_accessed),
    )(x_p, w1_p, b1, w2_p, b2_p)

    # Slice back to the logical (unpadded) shape.
    return out[:B, :ACTION_SIZE]


def init_params(key):
    """Deterministic init matching nn.Linear's default U(-1/sqrt(fan_in), +)."""
    k1, k2, k3, k4 = jax.random.split(key, 4)
    bound1 = 1.0 / jnp.sqrt(jnp.float32(STATE_SIZE))
    bound2 = 1.0 / jnp.sqrt(jnp.float32(HIDDEN_SIZE))
    # Stored pre-transposed: [in, out]
    w1_t = jax.random.uniform(k1, (STATE_SIZE, HIDDEN_SIZE), jnp.float32,
                              -bound1, bound1)
    b1 = jax.random.uniform(k2, (1, HIDDEN_SIZE), jnp.float32, -bound1, bound1)
    w2_t = jax.random.uniform(k3, (HIDDEN_SIZE, ACTION_SIZE), jnp.float32,
                              -bound2, bound2)
    b2 = jax.random.uniform(k4, (1, ACTION_SIZE), jnp.float32, -bound2, bound2)
    return w1_t, b1, w2_t, b2


# TODO(synk): training (_train_step / optimizer / MSELoss) and save_model are
# host-side PyTorch utilities with no forward-pass Pallas equivalent; only the
# forward() is implemented here.

if __name__ == "__main__":
    key = jax.random.PRNGKey(0)
    k_x, k_p = jax.random.split(key)

    B = 8
    x = jax.random.normal(k_x, (B, STATE_SIZE), jnp.float32)
    w1_t, b1, w2_t, b2 = init_params(k_p)
    w1_p, b1_p, w2_p, b2_p = prepare_params(w1_t, b1, w2_t, b2)

    out = simple_policy_net_forward(x, w1_p, b1_p, w2_p, b2_p)
    out = jax.block_until_ready(out)

    # Pure-JAX f32 reference of the forward semantics; the kernel runs bf16
    # inputs with f32 accumulation, so allow bf16-level tolerance.
    ref = (x @ w1_t + b1) @ w2_t + b2
    assert out.shape == (B, ACTION_SIZE)
    assert jnp.allclose(out, ref, atol=3e-2, rtol=3e-2), (
        float(jnp.max(jnp.abs(out - ref))))

    print("KERNEL_OK")
</pallas_src>

<mosaic_0001>
module attributes {stable_mosaic.version = 11 : i64} {
  func.func @_mlp_kernel(%arg0: i32, %arg1: memref<8x256xbf16, #tpu.memory_space<vmem>>, %arg2: memref<256x128xbf16, #tpu.memory_space<vmem>>, %arg3: memref<1x128xf32, #tpu.memory_space<vmem>>, %arg4: memref<128x128xbf16, #tpu.memory_space<vmem>>, %arg5: memref<1x128xf32, #tpu.memory_space<vmem>>, %arg6: memref<8x128xf32, #tpu.memory_space<vmem>>) attributes {dimension_semantics = [#tpu.dimension_semantics<parallel>], iteration_bounds = array<i64: 1>, scalar_prefetch = 0 : i64, scratch_operands = 0 : i64, tpu.core_type = #tpu.core_type<tc>, window_params = [{transform_indices = @transform_0, window_bounds = array<i64: 8, 256>}, {pipeline_mode = #tpu.pipeline_mode<synchronous>, transform_indices = @transform_1, window_bounds = array<i64: 256, 128>}, {pipeline_mode = #tpu.pipeline_mode<synchronous>, transform_indices = @transform_2, window_bounds = array<i64: 1, 128>}, {pipeline_mode = #tpu.pipeline_mode<synchronous>, transform_indices = @transform_3, window_bounds = array<i64: 128, 128>}, {pipeline_mode = #tpu.pipeline_mode<synchronous>, transform_indices = @transform_4, window_bounds = array<i64: 1, 128>}, {transform_indices = @transform_5, window_bounds = array<i64: 8, 128>}]} {
    %c0 = arith.constant 0 : index
    %c0_0 = arith.constant 0 : index
    %0 = vector.load %arg1[%c0, %c0_0] : memref<8x256xbf16, #tpu.memory_space<vmem>>, vector<8x256xbf16>
    %c0_1 = arith.constant 0 : index
    %c0_2 = arith.constant 0 : index
    %1 = vector.load %arg2[%c0_1, %c0_2] : memref<256x128xbf16, #tpu.memory_space<vmem>>, vector<256x128xbf16>
    %cst = arith.constant dense<0.000000e+00> : vector<8x128xf32>
    %2 = tpu.matmul %0, %1, %cst {dimension_numbers = #tpu.dot_dimension_numbers<[1], [0], [0], [1], [0, 0, 1, 1], [], []>} : vector<8x256xbf16>, vector<256x128xbf16>, vector<8x128xf32> -> vector<8x128xf32>
    %c0_3 = arith.constant 0 : index
    %c0_4 = arith.constant 0 : index
    %3 = vector.load %arg3[%c0_3, %c0_4] : memref<1x128xf32, #tpu.memory_space<vmem>>, vector<1x128xf32>
    %4 = vector.broadcast %3 : vector<1x128xf32> to vector<8x128xf32>
    %5 = arith.addf %2, %4 : vector<8x128xf32>
    %6 = arith.truncf %5 : vector<8x128xf32> to vector<8x128xbf16>
    %c0_5 = arith.constant 0 : index
    %c0_6 = arith.constant 0 : index
    %7 = vector.load %arg4[%c0_5, %c0_6] : memref<128x128xbf16, #tpu.memory_space<vmem>>, vector<128x128xbf16>
    %cst_7 = arith.constant dense<0.000000e+00> : vector<8x128xf32>
    %8 = tpu.matmul %6, %7, %cst_7 {dimension_numbers = #tpu.dot_dimension_numbers<[1], [0], [0], [1], [0, 0, 1, 1], [], []>} : vector<8x128xbf16>, vector<128x128xbf16>, vector<8x128xf32> -> vector<8x128xf32>
    %c0_8 = arith.constant 0 : index
    %c0_9 = arith.constant 0 : index
    %9 = vector.load %arg5[%c0_8, %c0_9] : memref<1x128xf32, #tpu.memory_space<vmem>>, vector<1x128xf32>
    %10 = vector.broadcast %9 : vector<1x128xf32> to vector<8x128xf32>
    %11 = arith.addf %8, %10 : vector<8x128xf32>
    %c0_10 = arith.constant 0 : index
    %c0_11 = arith.constant 0 : index
    %12 = vector.load %arg6[%c0_10, %c0_11] : memref<8x128xf32, #tpu.memory_space<vmem>>, vector<8x128xf32>
    tpu.vector_store %arg6[%c0_10, %c0_11], %11 {strides = array<i32>} : memref<8x128xf32, #tpu.memory_space<vmem>>, vector<8x128xf32>,
    return
  }
  func.func @transform_0(%arg0: i32) -> (i32, i32) {
    %c0_i32 = arith.constant 0 : i32
    %c0_i32_0 = arith.constant 0 : i32
    return %arg0, %c0_i32 : i32, i32
  }
  func.func @transform_1(%arg0: i32) -> (i32, i32) {
    %c0_i32 = arith.constant 0 : i32
    %c0_i32_0 = arith.constant 0 : i32
    %c0_i32_1 = arith.constant 0 : i32
    return %c0_i32, %c0_i32_0 : i32, i32
  }
  func.func @transform_2(%arg0: i32) -> (i32, i32) {
    %c0_i32 = arith.constant 0 : i32
    %c0_i32_0 = arith.constant 0 : i32
    %c0_i32_1 = arith.constant 0 : i32
    return %c0_i32, %c0_i32_0 : i32, i32
  }
  func.func @transform_3(%arg0: i32) -> (i32, i32) {
    %c0_i32 = arith.constant 0 : i32
    %c0_i32_0 = arith.constant 0 : i32
    %c0_i32_1 = arith.constant 0 : i32
    return %c0_i32, %c0_i32_0 : i32, i32
  }
  func.func @transform_4(%arg0: i32) -> (i32, i32) {
    %c0_i32 = arith.constant 0 : i32
    %c0_i32_0 = arith.constant 0 : i32
    %c0_i32_1 = arith.constant 0 : i32
    return %c0_i32, %c0_i32_0 : i32, i32
  }
  func.func @transform_5(%arg0: i32) -> (i32, i32) {
    %c0_i32 = arith.constant 0 : i32
    %c0_i32_0 = arith.constant 0 : i32
    return %arg0, %c0_i32 : i32, i32
  }
}

</mosaic_0001>

<bundles_post_ra>
// kernel: tpu_custom_call.1
= control target key start
LH: loop header
LB: loop body
LE: loop exit
PB: predicated region body
PF: predicated region fallthrough
CT: control target
= control target key end

     0   :  { %10 = vsyncpa [#allocation3], 0  ;;  %s617_s0 = inlined_call_operand.hbm [shape: bf16[8,256], index: 0, kind: input, shape index: {}]   ;;  %s618_s1 = inlined_call_operand.hbm [shape: bf16[256,128], index: 1, kind: input, shape index: {}]   ;;  %s619_s2 = inlined_call_operand.vmem [shape: f32[1,128], index: 2, kind: input, shape index: {}]   ;;  %s620_s3 = inlined_call_operand.hbm [shape: bf16[128,128], index: 3, kind: input, shape index: {}]   ;;  %s621_s4 = inlined_call_operand.vmem [shape: f32[1,128], index: 4, kind: input, shape index: {}]   ;;  %s622_s5 = inlined_call_operand.hbm [shape: f32[8,128], index: 5, kind: output, shape index: {}]  }
   0x1   :  { %11 = vsyncpa [#allocation6], 0  ;;  %s28_s20 = sshll.u32 %s618_s1, 4  ;;  %s29_s20 = int_to_ptr.hbm [resolvable:$true] %s28_s20 }
   0x2   :  { %12 = vsyncpa [#allocation4], 0  ;;  %s563_s21 = smov [#allocation5]   ;;  %s18_s25 = sshll.u32 %s617_s0, 4  ;;  %s19_s25 = int_to_ptr.hbm [resolvable:$true] %s18_s25 }
   0x3   :  { %s30_s22 = sshll.u32 %s563_s21, 4  ;;  %s564_s26 = smov 64   ;;  %s31_s22 = int_to_ptr.vmem [resolvable:$true] %s30_s22 }
   0x4   :  { %s565_s27 = smov 4   ;;  %s566_s28 = smov [#allocation2]  }
   0x5   :  { %36 = dma.hbm_to_vmem [thread:$0]  %s29_s20, 2048, %s31_s22, [#allocation6], %s564_s26, %s564_s26, %s565_s27  }
   0x6   :  { %s20_s29 = sshll.u32 %s566_s28, 4  ;;  %s43_s7 = sshll.u32 %s620_s3, 4  ;;  %s21_s29 = int_to_ptr.vmem [resolvable:$true] %s20_s29  ;;  %s44_s7 = int_to_ptr.hbm [resolvable:$true] %s43_s7 }
   0x7   :  { %23 = dma.hbm_to_vmem [thread:$0]  %s19_s25, 128, %s21_s29, [#allocation3]  }
   0x8   :  { %s567_s1 = smov [#allocation7]  }
   0x9   :  { %s45_s8 = sshll.u32 %s567_s1, 4  ;;  %s46_s8 = int_to_ptr.vmem [resolvable:$true] %s45_s8 }
   0xa   :  { %51 = dma.hbm_to_vmem [thread:$0]  %s44_s7, 1024, %s46_s8, [#allocation6], %s564_s26, %s564_s26, %s565_s27  }
   0xb   :  { %557 = dma.done.wait [#allocation3], 128  }
   0xc   :  { %558 = vsyncadd [#allocation3], 4294967168 }
   0xd   :  { %559 = dma.done.wait [#allocation6], 3072  }
   0xe   :  { %560 = vsyncadd [#allocation6], 4294964224  ;;  %v436_v0 = vld [vmem:[#allocation5 + $0x38] sm:$0xff]  ;;  %v435_v2 = vld [vmem:[#allocation5 + $0x30] sm:$0xff]  ;;  %s568_s11 = smov [#allocation8]   ;;  %s322_s15 = sshll.u32 %s622_s5, 4  ;;  %s323_s15 = int_to_ptr.hbm [resolvable:$true] %s322_s15 }
   0xf   :  { %v444_v1 = vld [vmem:[#allocation5 + $0x78] sm:$0xff]  ;;  %206 = vmatpush.bf16.msra.mxu0 %v436_v0  ;;  %v443_v3 = vld [vmem:[#allocation5 + $0x70] sm:$0xff]  ;;  %v434_v5 = vld [vmem:[#allocation5 + $0x28] sm:$0xff]  ;;  %s320_s12 = sshll.u32 %s568_s11, 4  ;;  %s321_s12 = int_to_ptr.vmem [resolvable:$true] %s320_s12 }
  0x10   :  { %219 = vmatpush.bf16.msra.mxu1 %v444_v1  ;;  %v452_v4 = vld [vmem:[#allocation7 + $0x38] sm:$0xff]  ;;  %v442_v6 = vld [vmem:[#allocation5 + $0x68] sm:$0xff]  ;;  %v451_v7 = vld [vmem:[#allocation7 + $0x30] sm:$0xff] }
  0x11   :  { %301 = vmatpush.bf16.msra.mxu2 %v452_v4  ;;  %v433_v8 = vld [vmem:[#allocation5 + $0x20] sm:$0xff]  ;;  %v450_v10 = vld [vmem:[#allocation7 + $0x28] sm:$0xff]  ;;  %v432_v11 = vld [vmem:[#allocation5 + $0x18] sm:$0xff] }
  0x12   :  { %v441_v9 = vld [vmem:[#allocation5 + $0x60] sm:$0xff]  ;;  %v440_v12 = vld [vmem:[#allocation5 + $0x58] sm:$0xff]  ;;  %v431_v14 = vld [vmem:[#allocation5 + $0x10] sm:$0xff] }
  0x13   :  { %207 = vmatpush.bf16.msra.mxu0 %v435_v2  ;;  %v449_v13 = vld [vmem:[#allocation7 + $0x20] sm:$0xff]  ;;  %v439_v15 = vld [vmem:[#allocation5 + $0x50] sm:$0xff]  ;;  %v448_v16 = vld [vmem:[#allocation7 + $0x18] sm:$0xff] }
  0x14   :  { %220 = vmatpush.bf16.msra.mxu1 %v443_v3  ;;  %v430_v17 = vld [vmem:[#allocation5 + $0x8] sm:$0xff]  ;;  %v66_v19 = vld [vmem:[#allocation2] sm:$0xff]  ;;  %v447_v20 = vld [vmem:[#allocation7 + $0x10] sm:$0xff] }
  0x15   :  { %302 = vmatpush.bf16.msra.mxu2 %v451_v7  ;;  %v438_v18 = vld [vmem:[#allocation5 + $0x48] sm:$0xff]  ;;  %v104_v21 = vunpack.c.l.b16 %v66_v19  ;;  %v105_v22 = vunpack.c.h.b16 %v66_v19  ;;  %v429_v23 = vld [vmem:[#allocation5] sm:$0xff]  ;;  %v459_v29 = vld [vmem:[%s619_s2] ss:$0 sm:$0xff] }
  0x16   :  { %v437_v24 = vld [vmem:[#allocation5 + $0x40] sm:$0xff]  ;;  %v446_v27 = vld [vmem:[#allocation7 + $0x8] sm:$0xff]  ;;  %v460_v37 = vld [vmem:[%s621_s4] ss:$0 sm:$0xff] }
  0x17   :  { %208 = vmatpush.bf16.msra.mxu0 %v434_v5  ;;  %v106_v25 = vpack.c.b16 %v104_v21, %v104_v21  ;;  %v107_v26 = vpack.c.b16 %v105_v22, %v105_v22  ;;  %v445_v28 = vld [vmem:[#allocation7] sm:$0xff] }
  0x18   :  { %221 = vmatpush.bf16.msra.mxu1 %v442_v6 }
  0x19   :  { %303 = vmatpush.bf16.msra.mxu2 %v450_v10 }
  0x1b   :  { %209 = vmatpush.bf16.msra.mxu0 %v433_v8 }
  0x1c   :  { %222 = vmatpush.bf16.msra.mxu1 %v441_v9 }
  0x1d   :  { %304 = vmatpush.bf16.msra.mxu2 %v449_v13 }
  0x1f   :  { %210 = vmatpush.bf16.msra.mxu0 %v432_v11 }
  0x20   :  { %223 = vmatpush.bf16.msra.mxu1 %v440_v12 }
  0x21   :  { %305 = vmatpush.bf16.msra.mxu2 %v448_v16 }
  0x23   :  { %211 = vmatpush.bf16.msra.mxu0 %v431_v14 }
  0x24   :  { %224 = vmatpush.bf16.msra.mxu1 %v439_v15 }
  0x25   :  { %306 = vmatpush.bf16.msra.mxu2 %v447_v20 }
  0x27   :  { %212 = vmatpush.bf16.msra.mxu0 %v430_v17 }
  0x28   :  { %225 = vmatpush.bf16.msra.mxu1 %v438_v18 }
  0x29   :  { %307 = vmatpush.bf16.msra.mxu2 %v446_v27 }
  0x2b   :  { %213 = vmatpush.bf16.msra.mxu0 %v429_v23 }
  0x2c   :  { %226 = vmatpush.bf16.msra.mxu1 %v437_v24 }
  0x2d   :  { %308 = vmatpush.bf16.msra.mxu2 %v445_v28 }
  0x2e   :  { %214 = vmatmul.bf16.vlgmr.msra.gmra.mxu0 %v106_v25 }
  0x2f   :  { %227 = vmatmul.bf16.vlgmr.msra.gmra.mxu1 %v107_v26 }
  0xab   :  { %v215_v30 = vpop.f32.mrf.mxu0 }
  0xac   :  { %v228_v31 = vpop.f32.mrf.mxu1  ;;  %v216_v32 = vadd.f32 %v459_v29, %v215_v30 }
  0xae   :  { %v229_v33 = vadd.f32 %v228_v31, %v216_v32 }
  0xb0   :  { %v232_v34 = vpack.c.bf16 %v229_v33, %v229_v33 }
  0xb2   :  { %309 = vmatmul.bf16.vlgmr.msra.gmra.mxu2 %v232_v34 }
  0xb3   :  { %v217_v35 = vpop.f32.mrf.mxu0 }
  0xb4   :  { %v230_v36 = vpop.f32.mrf.mxu1 }
 0x135   :  { %v310_v38 = vpop.f32.mrf.mxu2 }
 0x136   :  { %v311_v39 = vadd.f32 %v460_v37, %v310_v38 }
 0x138   :  { %314 = vst [vmem:[#allocation8] sm:$0xff] %v311_v39 }
 0x139   :  { %325 = dma.vmem_to_hbm [thread:$0]  %s321_s12, 128, %s323_s15, [#allocation4]  }
 0x13d   :  { %v312_v40 = vpop.f32.mrf.mxu2 }
 0x13e   :  { %561 = dma.done.wait [#allocation4], 128  }
 0x13f   :  { %562 = vsyncadd [#allocation4], 4294967168 }
 0x140   :  { %330 = vsyncpa [#allocation3], 1 }
 0x141   :  { %331 = vsyncpa [#allocation6], 1 }
 0x142   :  { %332 = vsyncpa [#allocation4], 1 }

</bundles_post_ra>
